<compile_context>
chip_gen: v5e
topology: v5e:2x2
jax: 0.10.0
libtpu: 0.0.40
codegen_flags: <defaults>
</compile_context>

<pallas_src>
import functools

import jax
import jax.numpy as jnp
from jax.experimental import pallas as pl
from jax.experimental.pallas import tpu as pltpu

LN_EPS = 1e-5
LANE = 128


def _round_up(x, m):
    return (x + m - 1) // m * m


def _patch_embed_kernel(*refs, kernel_size, stride, kcp, cout, th, wo, has_halo):
    """One grid step: TH output rows x Wo_pad output cols of one image.

    x_main_ref : (sp_main, TH, Wo_pad, KCp)  width-im2col rows [t*TH, (t+1)*TH)
    x_halo_ref : (sp_halo, 8,  Wo_pad, KCp)  next 8 rows (only when K > stride)
    w_ref      : (K*KCp, Cp)                 per-tap-row weight slab (zero padded)
    g_ref,b_ref: (1, Cp)                     LayerNorm affine params (zero padded)
    o_ref      : (TM, Cp)                    lane-dense normalized embedding tile
    slab_ref   : (TM, K*KCp) VMEM scratch    on-chip im2col patch slab
    """
    if has_halo:
        x_main_ref, x_halo_ref, w_ref, g_ref, b_ref, o_ref, slab_ref = refs
    else:
        x_main_ref, w_ref, g_ref, b_ref, o_ref, slab_ref = refs
        x_halo_ref = None
    K, s = kernel_size, stride
    tm = th * wo
    cp = o_ref.shape[-1]

    # --- on-chip im2col: K aligned copies into the patch slab (no concats) ---
    for kh in range(K):
        rk, qk = kh % s, kh // s
        c0 = kh * kcp
        if qk == 0:
            slab_ref[:, c0:c0 + kcp] = x_main_ref[rk].reshape(tm, kcp)
        else:
            nmain = (th - qk) * wo
            slab_ref[:nmain, c0:c0 + kcp] = x_main_ref[rk, qk:th].reshape(nmain, kcp)
            slab_ref[nmain:, c0:c0 + kcp] = x_halo_ref[rk, :qk].reshape(qk * wo, kcp)

    # --- one deep MXU contraction (depth K*KCp), f32 accumulation ---
    acc = jnp.dot(slab_ref[...], w_ref[...], preferred_element_type=jnp.float32)

    # --- LayerNorm over the real `cout` channels (padded lanes masked out) ---
    lane = jax.lax.broadcasted_iota(jnp.int32, (tm, cp), 1)
    valid = lane < cout
    mean = jnp.sum(jnp.where(valid, acc, 0.0), axis=-1, keepdims=True) / cout
    centered = acc - mean
    var = jnp.sum(jnp.where(valid, centered * centered, 0.0),
                  axis=-1, keepdims=True) / cout
    inv = jax.lax.rsqrt(var + LN_EPS)
    o_ref[...] = (centered * inv * g_ref[...] + b_ref[...]).astype(o_ref.dtype)


@functools.partial(jax.jit, static_argnames=("kernel_size", "stride", "target_rows",
                                              "out_layout", "out_dtype"))
def overlap_patch_embedding(x_nchw, conv_w, gamma, beta, *, kernel_size, stride,
                            target_rows=1024, out_layout="NCHW",
                            out_dtype=jnp.bfloat16):
    """x_nchw: [B, Cin, H, W]; conv_w: [Cout, Cin, K, K] (PyTorch layout).
    Returns [B, Cout, Ho, Wo] (NCHW, matching the module) or NHWC if requested."""
    B, Cin, H, W = x_nchw.shape
    Cout = conv_w.shape[0]
    K, s = kernel_size, stride
    p = K // 2
    Ho = (H + 2 * p - K) // s + 1
    Wo = (W + 2 * p - K) // s + 1

    qh_max = (K - 1) // s
    has_halo = qh_max > 0
    assert qh_max <= 8, "kernel_size too large relative to stride for the 8-row halo"

    KCp = _round_up(K * Cin, LANE)            # lane-dense width-im2col feature dim
    Cp = _round_up(max(Cout, LANE), LANE)     # lane-dense output channel dim
    Wo_pad = _round_up(Wo, 8)                 # sublane-aligned output width

    # Row tile: ~target_rows matmul rows per step, multiple of 8; keep >=2 grid steps.
    TH = max(8, _round_up(min(Ho, max(1, target_rows // Wo_pad)), 8))
    TH = min(TH, _round_up(Ho, 8))
    if B == 1 and Ho > 8 and -(-Ho // TH) < 2:
        TH = _round_up(-(-Ho // 2), 8)
    nTH = -(-Ho // TH)
    TM = TH * Wo_pad

    Hq = nTH * TH + (8 if has_halo else 0)    # deinterleaved row extent (H' axis)
    Hp = Hq * s                               # padded input row extent
    Wp = (Wo_pad - 1) * s + K                 # padded input col extent

    cdt = jnp.bfloat16                        # MXU stream dtype (f32 accumulation)

    # ---- input repack: pad, width-only im2col (lane-dense), row s-deinterleave ----
    x_nhwc = jnp.transpose(x_nchw, (0, 2, 3, 1))                       # (B,H,W,Cin)
    rows_keep = min(H, Hp - p)
    cols_keep = min(W, Wp - p)
    xp = jnp.pad(x_nhwc[:, :rows_keep, :cols_keep, :],
                 ((0, 0), (p, Hp - p - rows_keep), (p, Wp - p - cols_keep), (0, 0)))
    cols = [xp[:, :, kw:kw + (Wo_pad - 1) * s + 1:s, :] for kw in range(K)]
    xw = jnp.stack(cols, axis=3).reshape(B, Hp, Wo_pad, K * Cin)
    xw = jnp.pad(xw, ((0, 0), (0, 0), (0, 0), (0, KCp - K * Cin))).astype(cdt)
    x5 = jnp.transpose(xw.reshape(B, Hq, s, Wo_pad, KCp), (0, 2, 1, 3, 4))

    # ---- weight repack: (Cout,Cin,K,K) -> (K*KCp, Cp), zero-padded ----
    w_t = jnp.transpose(conv_w, (2, 3, 1, 0)).reshape(K, K * Cin, Cout)
    w2 = jnp.zeros((K, KCp, Cp), jnp.float32).at[:, :K * Cin, :Cout].set(
        w_t.astype(jnp.float32))
    w2 = w2.reshape(K * KCp, Cp).astype(cdt)

    g2 = jnp.zeros((1, Cp), jnp.float32).at[0, :Cout].set(gamma.astype(jnp.float32))
    b2 = jnp.zeros((1, Cp), jnp.float32).at[0, :Cout].set(beta.astype(jnp.float32))

    sp_main = min(K, s)                       # input row-phases the main block needs
    sp_halo = min(max(K - s, 1), s)           # row-phases with halo (qk>=1) taps

    th8 = TH // 8
    in_specs = [pl.BlockSpec((None, sp_main, TH, Wo_pad, KCp),
                             lambda b, t: (b, 0, t, 0, 0))]
    inputs = [x5]
    if has_halo:
        in_specs.append(pl.BlockSpec((None, sp_halo, 8, Wo_pad, KCp),
                                     lambda b, t: (b, 0, (t + 1) * th8, 0, 0)))
        inputs.append(x5)
    in_specs += [
        pl.BlockSpec((K * KCp, Cp), lambda b, t: (0, 0)),
        pl.BlockSpec((1, Cp), lambda b, t: (0, 0)),
        pl.BlockSpec((1, Cp), lambda b, t: (0, 0)),
    ]
    inputs += [w2, g2, b2]

    # VMEM budget: ~2x the per-step working set (streams are double-buffered).
    stream_bytes = ((sp_main * TH + (sp_halo * 8 if has_halo else 0)) * Wo_pad * KCp * 2
                    + K * KCp * Cp * 2 + 2 * Cp * 4
                    + TM * Cp * jnp.dtype(out_dtype).itemsize)
    slab_bytes = TM * K * KCp * 2
    vmem_limit = int(min(max(2 * (2 * stream_bytes + slab_bytes), 16 * 2**20),
                         48 * 2**20))

    kernel = functools.partial(
        _patch_embed_kernel, kernel_size=K, stride=s, kcp=KCp, cout=Cout,
        th=TH, wo=Wo_pad, has_halo=has_halo)

    out3 = pl.pallas_call(
        kernel,
        out_shape=jax.ShapeDtypeStruct((B, nTH * TM, Cp), out_dtype),
        grid_spec=pltpu.PrefetchScalarGridSpec(
            num_scalar_prefetch=0,
            grid=(B, nTH),
            in_specs=in_specs,
            out_specs=pl.BlockSpec((None, TM, Cp), lambda b, t: (b, t, 0)),
            scratch_shapes=[pltpu.VMEM((TM, K * KCp), cdt)],
        ),
        compiler_params=pltpu.CompilerParams(
            dimension_semantics=("parallel", "parallel"),
            vmem_limit_bytes=vmem_limit,
        ),
    )(*inputs)

    out = out3.reshape(B, nTH * TH, Wo_pad, Cp)[:, :Ho, :Wo, :Cout]
    if out_layout == "NCHW":
        out = jnp.transpose(out, (0, 3, 1, 2))
    return out


def _reference(x_nchw, conv_w, gamma, beta, *, kernel_size, stride,
               compute_dtype=jnp.bfloat16):
    """Pure-JAX reference (lax conv + layernorm) with the same bf16 matmul streams."""
    p = kernel_size // 2
    y = jax.lax.conv_general_dilated(
        x_nchw.astype(compute_dtype), conv_w.astype(compute_dtype),
        window_strides=(stride, stride),
        padding=((p, p), (p, p)),
        dimension_numbers=("NCHW", "OIHW", "NCHW"),
        preferred_element_type=jnp.float32,
    )
    y = jnp.transpose(y, (0, 2, 3, 1))  # NHWC
    mean = jnp.mean(y, axis=-1, keepdims=True)
    var = jnp.mean((y - mean) ** 2, axis=-1, keepdims=True)
    y = (y - mean) * jax.lax.rsqrt(var + LN_EPS) * gamma + beta
    return jnp.transpose(y, (0, 3, 1, 2))


if __name__ == "__main__":
    def run_case(key, B, Cin, H, W, Cout, K, stride, tol):
        k_x, k_w, k_g, k_b = jax.random.split(key, 4)
        x = jax.random.normal(k_x, (B, Cin, H, W), dtype=jnp.float32)
        conv_w = jax.random.normal(k_w, (Cout, Cin, K, K), dtype=jnp.float32) * 0.1
        gamma = 1.0 + 0.05 * jax.random.normal(k_g, (Cout,), dtype=jnp.float32)
        beta = 0.05 * jax.random.normal(k_b, (Cout,), dtype=jnp.float32)

        out = overlap_patch_embedding(x, conv_w, gamma, beta,
                                      kernel_size=K, stride=stride)
        out = jax.block_until_ready(out)

        p = K // 2
        Ho = (H + 2 * p - K) // stride + 1
        Wo = (W + 2 * p - K) // stride + 1
        assert out.shape == (B, Cout, Ho, Wo), out.shape

        ref = _reference(x, conv_w, gamma, beta, kernel_size=K, stride=stride)
        err = float(jnp.max(jnp.abs(out.astype(jnp.float32) - ref)))
        assert err < tol, (err, (K, stride))

    key = jax.random.PRNGKey(0)
    k1, k2 = jax.random.split(key)
    # Halo path (K > stride): Conv2d(4->32, k=3, s=2, p=1) + LayerNorm2d.
    run_case(k1, B=2, Cin=4, H=16, W=16, Cout=32, K=3, stride=2, tol=2e-2)
    # No-halo path (K <= stride, like default stage 0): Conv2d(4->32, k=3, s=4, p=1) + LN2d.
    run_case(k2, B=2, Cin=4, H=16, W=16, Cout=32, K=3, stride=4, tol=2e-2)

    print("KERNEL_OK")
</pallas_src>

<mosaic_0001>
module attributes {stable_mosaic.version = 11 : i64} {
  func.func @_patch_embed_kernel(%arg0: i32, %arg1: i32, %arg2: memref<1x2x8x8x128xbf16, #tpu.memory_space<vmem>>, %arg3: memref<1x1x8x8x128xbf16, #tpu.memory_space<vmem>>, %arg4: memref<384x128xbf16, #tpu.memory_space<vmem>>, %arg5: memref<1x128xf32, #tpu.memory_space<vmem>>, %arg6: memref<1x128xf32, #tpu.memory_space<vmem>>, %arg7: memref<1x64x128xbf16, #tpu.memory_space<vmem>>, %arg8: memref<64x384xbf16, #tpu.memory_space<vmem>>) attributes {dimension_semantics = [#tpu.dimension_semantics<parallel>, #tpu.dimension_semantics<parallel>], iteration_bounds = array<i64: 2, 1>, scalar_prefetch = 0 : i64, scratch_operands = 1 : i64, tpu.core_type = #tpu.core_type<tc>, window_params = [{transform_indices = @transform_0, window_bounds = array<i64: 1, 2, 8, 8, 128>}, {transform_indices = @transform_1, window_bounds = array<i64: 1, 1, 8, 8, 128>}, {pipeline_mode = #tpu.pipeline_mode<synchronous>, transform_indices = @transform_2, window_bounds = array<i64: 384, 128>}, {pipeline_mode = #tpu.pipeline_mode<synchronous>, transform_indices = @transform_3, window_bounds = array<i64: 1, 128>}, {pipeline_mode = #tpu.pipeline_mode<synchronous>, transform_indices = @transform_4, window_bounds = array<i64: 1, 128>}, {transform_indices = @transform_5, window_bounds = array<i64: 1, 64, 128>}]} {
    %c0 = arith.constant 0 : index
    %c0_0 = arith.constant 0 : index
    %c0_1 = arith.constant 0 : index
    %c0_2 = arith.constant 0 : index
    %c0_3 = arith.constant 0 : index
    %0 = vector.load %arg2[%c0, %c0_0, %c0_1, %c0_2, %c0_3] : memref<1x2x8x8x128xbf16, #tpu.memory_space<vmem>>, vector<1x1x8x8x128xbf16>
    %1 = vector.shape_cast %0 : vector<1x1x8x8x128xbf16> to vector<8x8x128xbf16>
    %2 = vector.shape_cast %1 : vector<8x8x128xbf16> to vector<64x128xbf16>
    %c0_4 = arith.constant 0 : index
    %c0_5 = arith.constant 0 : index
    %3 = vector.load %arg8[%c0_4, %c0_5] : memref<64x384xbf16, #tpu.memory_space<vmem>>, vector<64x128xbf16>
    tpu.vector_store %arg8[%c0_4, %c0_5], %2 {strides = array<i32>} : memref<64x384xbf16, #tpu.memory_space<vmem>>, vector<64x128xbf16>,
    %c0_6 = arith.constant 0 : index
    %c1 = arith.constant 1 : index
    %c0_7 = arith.constant 0 : index
    %c0_8 = arith.constant 0 : index
    %c0_9 = arith.constant 0 : index
    %4 = vector.load %arg2[%c0_6, %c1, %c0_7, %c0_8, %c0_9] : memref<1x2x8x8x128xbf16, #tpu.memory_space<vmem>>, vector<1x1x8x8x128xbf16>
    %5 = vector.shape_cast %4 : vector<1x1x8x8x128xbf16> to vector<8x8x128xbf16>
    %6 = vector.shape_cast %5 : vector<8x8x128xbf16> to vector<64x128xbf16>
    %c0_10 = arith.constant 0 : index
    %c128 = arith.constant 128 : index
    %7 = vector.load %arg8[%c0_10, %c128] : memref<64x384xbf16, #tpu.memory_space<vmem>>, vector<64x128xbf16>
    tpu.vector_store %arg8[%c0_10, %c128], %6 {strides = array<i32>} : memref<64x384xbf16, #tpu.memory_space<vmem>>, vector<64x128xbf16>,
    %c0_11 = arith.constant 0 : index
    %c0_12 = arith.constant 0 : index
    %c1_13 = arith.constant 1 : index
    %c0_14 = arith.constant 0 : index
    %c0_15 = arith.constant 0 : index
    %8 = vector.load %arg2[%c0_11, %c0_12, %c1_13, %c0_14, %c0_15] : memref<1x2x8x8x128xbf16, #tpu.memory_space<vmem>>, vector<1x1x7x8x128xbf16>
    %9 = vector.shape_cast %8 : vector<1x1x7x8x128xbf16> to vector<7x8x128xbf16>
    %10 = vector.shape_cast %9 : vector<7x8x128xbf16> to vector<56x128xbf16>
    %c0_16 = arith.constant 0 : index
    %c256 = arith.constant 256 : index
    %11 = vector.load %arg8[%c0_16, %c256] : memref<64x384xbf16, #tpu.memory_space<vmem>>, vector<56x128xbf16>
    tpu.vector_store %arg8[%c0_16, %c256], %10 {strides = array<i32>} : memref<64x384xbf16, #tpu.memory_space<vmem>>, vector<56x128xbf16>,
    %c0_17 = arith.constant 0 : index
    %c0_18 = arith.constant 0 : index
    %c0_19 = arith.constant 0 : index
    %c0_20 = arith.constant 0 : index
    %c0_21 = arith.constant 0 : index
    %12 = vector.load %arg3[%c0_17, %c0_18, %c0_19, %c0_20, %c0_21] : memref<1x1x8x8x128xbf16, #tpu.memory_space<vmem>>, vector<1x1x1x8x128xbf16>
    %13 = vector.shape_cast %12 : vector<1x1x1x8x128xbf16> to vector<1x8x128xbf16>
    %14 = vector.shape_cast %13 : vector<1x8x128xbf16> to vector<8x128xbf16>
    %c56 = arith.constant 56 : index
    %c256_22 = arith.constant 256 : index
    %15 = vector.load %arg8[%c56, %c256_22] : memref<64x384xbf16, #tpu.memory_space<vmem>>, vector<8x128xbf16>
    tpu.vector_store %arg8[%c56, %c256_22], %14 {strides = array<i32>} : memref<64x384xbf16, #tpu.memory_space<vmem>>, vector<8x128xbf16>,
    %c0_23 = arith.constant 0 : index
    %c0_24 = arith.constant 0 : index
    %16 = vector.load %arg8[%c0_23, %c0_24] : memref<64x384xbf16, #tpu.memory_space<vmem>>, vector<64x384xbf16>
    %c0_25 = arith.constant 0 : index
    %c0_26 = arith.constant 0 : index
    %17 = vector.load %arg4[%c0_25, %c0_26] : memref<384x128xbf16, #tpu.memory_space<vmem>>, vector<384x128xbf16>
    %cst = arith.constant dense<0.000000e+00> : vector<64x128xf32>
    %18 = tpu.matmul %16, %17, %cst {dimension_numbers = #tpu.dot_dimension_numbers<[1], [0], [0], [1], [0, 0, 1, 1], [], []>} : vector<64x384xbf16>, vector<384x128xbf16>, vector<64x128xf32> -> vector<64x128xf32>
    %19 = tpu.iota {dimensions = array<i32: 1>} : vector<64x128xi32>
    %c32_i32 = arith.constant 32 : i32
    %20 = vector.broadcast %c32_i32 : i32 to vector<64x128xi32>
    %21 = arith.cmpi slt, %19, %20 : vector<64x128xi32>
    %cst_27 = arith.constant 0.000000e+00 : f32
    %22 = vector.broadcast %cst_27 : f32 to vector<64x128xf32>
    %23 = arith.select %21, %18, %22 : vector<64x128xi1>, vector<64x128xf32>
    %cst_28 = arith.constant dense<0.000000e+00> : vector<64xf32>
    %24 = vector.multi_reduction <add>, %23, %cst_28 [1] : vector<64x128xf32> to vector<64xf32>
    %25 = vector.shape_cast %24 : vector<64xf32> to vector<64x1xf32>
    %cst_29 = arith.constant 3.200000e+01 : f32
    %26 = vector.broadcast %cst_29 : f32 to vector<64x1xf32>
    %27 = arith.divf %25, %26 : vector<64x1xf32>
    %28 = vector.broadcast %27 : vector<64x1xf32> to vector<64x128xf32>
    %29 = arith.subf %18, %28 : vector<64x128xf32>
    %30 = arith.mulf %29, %29 : vector<64x128xf32>
    %cst_30 = arith.constant 0.000000e+00 : f32
    %31 = vector.broadcast %cst_30 : f32 to vector<64x128xf32>
    %32 = arith.select %21, %30, %31 : vector<64x128xi1>, vector<64x128xf32>
    %cst_31 = arith.constant dense<0.000000e+00> : vector<64xf32>
    %33 = vector.multi_reduction <add>, %32, %cst_31 [1] : vector<64x128xf32> to vector<64xf32>
    %34 = vector.shape_cast %33 : vector<64xf32> to vector<64x1xf32>
    %cst_32 = arith.constant 3.200000e+01 : f32
    %35 = vector.broadcast %cst_32 : f32 to vector<64x1xf32>
    %36 = arith.divf %34, %35 : vector<64x1xf32>
    %cst_33 = arith.constant 9.99999974E-6 : f32
    %37 = vector.broadcast %cst_33 : f32 to vector<64x1xf32>
    %38 = arith.addf %36, %37 : vector<64x1xf32>
    %39 = math.rsqrt %38 : vector<64x1xf32>
    %40 = vector.broadcast %39 : vector<64x1xf32> to vector<64x128xf32>
    %41 = arith.mulf %29, %40 : vector<64x128xf32>
    %c0_34 = arith.constant 0 : index
    %c0_35 = arith.constant 0 : index
    %42 = vector.load %arg5[%c0_34, %c0_35] : memref<1x128xf32, #tpu.memory_space<vmem>>, vector<1x128xf32>
    %43 = vector.broadcast %42 : vector<1x128xf32> to vector<64x128xf32>
    %44 = arith.mulf %41, %43 : vector<64x128xf32>
    %c0_36 = arith.constant 0 : index
    %c0_37 = arith.constant 0 : index
    %45 = vector.load %arg6[%c0_36, %c0_37] : memref<1x128xf32, #tpu.memory_space<vmem>>, vector<1x128xf32>
    %46 = vector.broadcast %45 : vector<1x128xf32> to vector<64x128xf32>
    %47 = arith.addf %44, %46 : vector<64x128xf32>
    %48 = arith.truncf %47 : vector<64x128xf32> to vector<64x128xbf16>
    %c0_38 = arith.constant 0 : index
    %c0_39 = arith.constant 0 : index
    %c0_40 = arith.constant 0 : index
    %49 = vector.load %arg7[%c0_38, %c0_39, %c0_40] : memref<1x64x128xbf16, #tpu.memory_space<vmem>>, vector<1x64x128xbf16>
    %50 = vector.shape_cast %49 : vector<1x64x128xbf16> to vector<64x128xbf16>
    %51 = vector.shape_cast %48 : vector<64x128xbf16> to vector<1x64x128xbf16>
    tpu.vector_store %arg7[%c0_38, %c0_39, %c0_40], %51 {strides = array<i32>} : memref<1x64x128xbf16, #tpu.memory_space<vmem>>, vector<1x64x128xbf16>,
    return
  }
  func.func @transform_0(%arg0: i32, %arg1: i32) -> (i32, i32, i32, i32, i32) {
    %c0_i32 = arith.constant 0 : i32
    %c0_i32_0 = arith.constant 0 : i32
    %c0_i32_1 = arith.constant 0 : i32
    %c0_i32_2 = arith.constant 0 : i32
    return %arg0, %c0_i32, %arg1, %c0_i32_0, %c0_i32_1 : i32, i32, i32, i32, i32
  }
  func.func @transform_1(%arg0: i32, %arg1: i32) -> (i32, i32, i32, i32, i32) {
    %c1_i32 = arith.constant 1 : i32
    %0 = arith.addi %arg1, %c1_i32 : i32
    %c1_i32_0 = arith.constant 1 : i32
    %1 = arith.muli %0, %c1_i32_0 : i32
    %c0_i32 = arith.constant 0 : i32
    %c0_i32_1 = arith.constant 0 : i32
    %c0_i32_2 = arith.constant 0 : i32
    %c0_i32_3 = arith.constant 0 : i32
    return %arg0, %c0_i32, %1, %c0_i32_1, %c0_i32_2 : i32, i32, i32, i32, i32
  }
  func.func @transform_2(%arg0: i32, %arg1: i32) -> (i32, i32) {
    %c0_i32 = arith.constant 0 : i32
    %c0_i32_0 = arith.constant 0 : i32
    %c0_i32_1 = arith.constant 0 : i32
    return %c0_i32, %c0_i32_0 : i32, i32
  }
  func.func @transform_3(%arg0: i32, %arg1: i32) -> (i32, i32) {
    %c0_i32 = arith.constant 0 : i32
    %c0_i32_0 = arith.constant 0 : i32
    %c0_i32_1 = arith.constant 0 : i32
    return %c0_i32, %c0_i32_0 : i32, i32
  }
  func.func @transform_4(%arg0: i32, %arg1: i32) -> (i32, i32) {
    %c0_i32 = arith.constant 0 : i32
    %c0_i32_0 = arith.constant 0 : i32
    %c0_i32_1 = arith.constant 0 : i32
    return %c0_i32, %c0_i32_0 : i32, i32
  }
  func.func @transform_5(%arg0: i32, %arg1: i32) -> (i32, i32, i32) {
    %c0_i32 = arith.constant 0 : i32
    %c0_i32_0 = arith.constant 0 : i32
    return %arg0, %arg1, %c0_i32 : i32, i32, i32
  }
}

</mosaic_0001>

<bundles_post_ra>
// kernel: overlap_patch_embedding.1
= control target key start
LH: loop header
LB: loop body
LE: loop exit
PB: predicated region body
PF: predicated region fallthrough
CT: control target
= control target key end

     0   :  { %s1521_s18 = smov 0   ;;  %s1523_s19 = smov 0   ;;  %s1822_s0 = inlined_call_operand.vmem [shape: bf16[2,2,16,8,128], index: 0, kind: input, shape index: {}, may-alias: {0,1}]   ;;  %s1823_s1 = inlined_call_operand.vmem [shape: bf16[2,2,16,8,128], index: 1, kind: input, shape index: {}, may-alias: {0,1}]   ;;  %s1824_s2 = inlined_call_operand.vmem [shape: bf16[384,128], index: 2, kind: input, shape index: {}]   ;;  %s1825_s3 = inlined_call_operand.vmem [shape: f32[1,128], index: 3, kind: input, shape index: {}]   ;;  %s1826_s4 = inlined_call_operand.vmem [shape: f32[1,128], index: 4, kind: input, shape index: {}]   ;;  %s1827_s5 = inlined_call_operand.vmem [shape: bf16[2,64,128], index: 5, kind: output, shape index: {}]  }
   0x1   :  { %s1525_s20 = smov 0   ;;  %s1527_s21 = smov 0  }
   0x2   :  { %s1529_s22 = smov 0  }
   0x3 LB: > { %s27_s23 = sadd.s32 1, %s1484_s21  ;;  %p43_p1 = scmp.ne.s32.totalorder %s1476_s19, %s1472_s18  ;;  %s1488_s22 = sphi %s1529_s22, %s15_s22   ;;  %s1484_s21 = sphi %s1527_s21, %s1831_s21   ;;  %s1480_s20 = sphi %s1525_s20, %s1830_s20   ;;  %s1476_s19 = sphi %s1523_s19, %s1829_s19   ;;  %s1472_s18 = sphi %s1521_s18, %s1828_s18  }
   0x4   : > { %p29_p0 = scmp.ge.s32.totalorder %s27_s23, 2  ;;  %p44_p2 = scmp.eq.s32.totalorder %s1488_s22, 0 }
   0x5   : > { %s36_s25 = sadd.s32 1, %s1476_s19  ;;  %p1146_p5 = scmp.ge.s32.totalorder %s1488_s22, 2 }
   0x6   : > { %s1833_s23 = smov (%p29_p0, %s27_s23), 0  ;;  %p45_p3 = por %p44_p2, %p43_p1 }
   0x7   : > { %s31_s24 = ssub.s32 %s1484_s21, %s1833_s23  ;;  %199 = sbr.rel (%p1146_p5) target bundleno = 24 (0x18), region = 28 }
   0x8   : > { %p34_p4 = scmp.eq.s32.totalorder %s31_s24, 0 }
   0xa   : > { %s1556_s26 = scalar_select %p34_p4, %s1476_s19, %s36_s25  }
   0xc   : > { %202 = sbr.rel (!%p45_p3) target bundleno = 24 (0x18), region = 32  ;;  %s204_s27 = sand.u32 (%p45_p3), 1, %s1476_s19  }
   0xd   : > { %s1317_s28 = sshll.u32 (%p45_p3), %s1484_s21, 7  ;;  %s1147_s29 = sshll.u32 (%p45_p3), %s204_s27, 6 }
   0xe   : > { %s211_s7 = scalar_lea.vmem (%p45_p3), %s1822_s0, %s1317_s28  ;;  %s206_s8 = scalar_lea.vmem (%p45_p3), [#allocation3], %s1147_s29 }
   0xf   : > { %v228_v0 = vld [vmem:[%s211_s7] sm:$0xff] (%p45_p3)   ;;  %v232_v1 = vld [vmem:[%s211_s7 + $0x8] sm:$0xff] (%p45_p3)   ;;  %v236_v2 = vld [vmem:[%s211_s7 + $0x10] sm:$0xff] (%p45_p3)  }
  0x10   : > { %229 = vst [vmem:[%s206_s8] sm:$0xff] (%p45_p3), %v228_v0   ;;  %v240_v3 = vld [vmem:[%s211_s7 + $0x18] sm:$0xff] (%p45_p3)   ;;  %v244_v4 = vld [vmem:[%s211_s7 + $0x40] sm:$0xff] (%p45_p3)   ;;  %v248_v5 = vld [vmem:[%s211_s7 + $0x48] sm:$0xff] (%p45_p3)  }
  0x11   : > { %233 = vst [vmem:[%s206_s8 + $0x8] sm:$0xff] %v232_v1   ;;  %v252_v6 = vld [vmem:[%s211_s7 + $0x50] sm:$0xff]   ;;  %v256_v7 = vld [vmem:[%s211_s7 + $0x58] sm:$0xff]  }
  0x12   : > { %237 = vst [vmem:[%s206_s8 + $0x10] sm:$0xff] %v236_v2  }
  0x13   : > { %241 = vst [vmem:[%s206_s8 + $0x18] sm:$0xff] %v240_v3  }
  0x14   : > { %245 = vst [vmem:[%s206_s8 + $0x20] sm:$0xff] %v244_v4  }
  0x15   : > { %249 = vst [vmem:[%s206_s8 + $0x28] sm:$0xff] %v248_v5  }
  0x16   : > { %253 = vst [vmem:[%s206_s8 + $0x30] sm:$0xff] %v252_v6  }
  0x17   : > { %257 = vst [vmem:[%s206_s8 + $0x38] sm:$0xff] %v256_v7  }
  0x18 PF: > { %p1150_p6 = scmp.ge.s32.totalorder %s1488_s22, 1  ;;  %p329_p7 = scmp.lt.s32.totalorder %s1488_s22, 3 }
  0x1a   : > { %p330_p8 = pnand %p1150_p6, %p329_p7 }
  0x1b   : > { %s336_s15 = sand.u32 (!%p330_p8), 1, %s1472_s18   ;;  %p380_p9 = scmp.lt.s32.totalorder (!%p330_p8), %s1480_s20, 1 }
  0x1c   : > { %333 = sbr.rel (%p330_p8) target bundleno = 528 (0x210), region = 77  ;;  %s1151_s27 = sshll.u32 (!%p330_p8), %s336_s15, 6 }
  0x1d   : > { %s1594_s10 = scalar_lea.vmem (!%p330_p8), [#allocation3], %s1151_s27 }
  0x21   : > { %v1340_v8 = vld [vmem:[%s1824_s2 + $0x38] sm:$0xff]  ;;  %v1339_v11 = vld [vmem:[%s1824_s2 + $0x30] sm:$0xff]  ;;  %v1338_v14 = vld [vmem:[%s1824_s2 + $0x28] sm:$0xff]  ;;  %s1835_s20 = smov (!%p380_p9, %s1480_s20), 1 }
  0x22   : > { %v1348_v9 = vld [vmem:[%s1824_s2 + $0x78] sm:$0xff]  ;;  %722 = vmatpush.bf16.msra.mxu0 %v1340_v8  ;;  %v1347_v12 = vld [vmem:[%s1824_s2 + $0x70] sm:$0xff]  ;;  %1381 = vmatpush.bf16.msra.mxu3 %v1340_v8  ;;  %v1346_v15 = vld [vmem:[%s1824_s2 + $0x68] sm:$0xff]  ;;  %s1377_s18 = sshll.u32 %s1835_s20, 7  ;;  %s1320_s13 = sshll.u32 %s1835_s20, 5 }
  0x23   : > { %v1356_v10 = vld [vmem:[%s1824_s2 + $0xb8] sm:$0xff]  ;;  %751 = vmatpush.bf16.msra.mxu1 %v1348_v9  ;;  %v1355_v13 = vld [vmem:[%s1824_s2 + $0xb0] sm:$0xff]  ;;  %v1354_v16 = vld [vmem:[%s1824_s2 + $0xa8] sm:$0xff]  ;;  %s1319_s30 = sadd.s32 32, %s1377_s18  ;;  %s1780_s16 = scalar_lea.vmem %s1827_s5, %s1320_s13 }
  0x24   : > { %780 = vmatpush.bf16.msra.mxu2 %v1356_v10  ;;  %v400_v17 = vld [vmem:[%s1594_s10] sm:$0xf]  ;;  %v401_v18 = vld [vmem:[%s1594_s10 + $0x4] sm:$0xf]  ;;  %v1165_v25 = vld [vmem:[%s1594_s10 + $0x8] sm:$0xf]  ;;  %s387_s8 = scalar_lea.vmem %s1823_s1, %s1319_s30 }
  0x25   : > { %v1156_v19 = vld [vmem:[%s1594_s10 + $0x20] sm:$0xf]  ;;  %408 = vst [vmem:[#allocation2] sm:$0xf] %v400_v17  ;;  %v1157_v20 = vld [vmem:[%s1594_s10 + $0x24] sm:$0xf] }
  0x26   : > { %723 = vmatpush.bf16.msra.mxu0 %v1339_v11  ;;  %1382 = vmatpush.bf16.msra.mxu3 %v1339_v11  ;;  %v1337_v21 = vld [vmem:[%s1824_s2 + $0x20] sm:$0xff]  ;;  %409 = vst [vmem:[#allocation2 + $0xc] sm:$0xf] %v401_v18  ;;  %v1336_v26 = vld [vmem:[%s1824_s2 + $0x18] sm:$0xff]  ;;  %v402_v27 = vld [vmem:[%s1594_s10 + $0x8] sm:$0xf] }
  0x27   : > { %752 = vmatpush.bf16.msra.mxu1 %v1347_v12  ;;  %v1345_v22 = vld [vmem:[%s1824_s2 + $0x60] sm:$0xff]  ;;  %425 = vst [vmem:[#allocation2 + $0x4] sm:$0xf] %v1156_v19  ;;  %v1344_v28 = vld [vmem:[%s1824_s2 + $0x58] sm:$0xff]  ;;  %v403_v30 = vld [vmem:[%s1594_s10 + $0xc] sm:$0xf] }
  0x28   : > { %781 = vmatpush.bf16.msra.mxu2 %v1355_v13  ;;  %v1164_v23 = vld [vmem:[%s1594_s10 + $0x4] sm:$0xf]  ;;  %426 = vst [vmem:[#allocation2 + $0x10] sm:$0xf] %v1157_v20  ;;  %v1352_v29 = vld [vmem:[%s1824_s2 + $0x98] sm:$0xff]  ;;  %v1335_v35 = vld [vmem:[%s1824_s2 + $0x10] sm:$0xff] }
  0x29   : > { %v1353_v24 = vld [vmem:[%s1824_s2 + $0xa0] sm:$0xff]  ;;  %441 = vst [vmem:[#allocation2 + $0x8] sm:$0xf] %v1164_v23  ;;  %v1158_v31 = vld [vmem:[%s1594_s10 + $0x28] sm:$0xf]  ;;  %v1343_v36 = vld [vmem:[%s1824_s2 + $0x50] sm:$0xff] }
  0x2a   : > { %724 = vmatpush.bf16.msra.mxu0 %v1338_v14  ;;  %1383 = vmatpush.bf16.msra.mxu3 %v1338_v14  ;;  %442 = vst [vmem:[#allocation2 + $0x14] sm:$0xf] %v1165_v25  ;;  %v1159_v32 = vld [vmem:[%s1594_s10 + $0x2c] sm:$0xf]  ;;  %v1167_v34 = vld [vmem:[%s1594_s10 + $0x10] sm:$0xf] }
  0x2b   : > { %753 = vmatpush.bf16.msra.mxu1 %v1346_v15  ;;  %410 = vst [vmem:[#allocation2 + $0x18] sm:$0xf] %v402_v27  ;;  %v1166_v33 = vld [vmem:[%s1594_s10 + $0xc] sm:$0xf]  ;;  %v404_v37 = vld [vmem:[%s1594_s10 + $0x10] sm:$0xf] }
  0x2c   : > { %782 = vmatpush.bf16.msra.mxu2 %v1354_v16  ;;  %411 = vst [vmem:[#allocation2 + $0x24] sm:$0xf] %v403_v30  ;;  %v1351_v38 = vld [vmem:[%s1824_s2 + $0x90] sm:$0xff]  ;;  %v1334_v42 = vld [vmem:[%s1824_s2 + $0x8] sm:$0xff]  ;;  %v1333_v46 = vld [vmem:[%s1824_s2] sm:$0xff] }
  0x2d   : > { %427 = vst [vmem:[#allocation2 + $0x1c] sm:$0xf] %v1158_v31  ;;  %v405_v39 = vld [vmem:[%s1594_s10 + $0x14] sm:$0xf]  ;;  %v1160_v40 = vld [vmem:[%s1594_s10 + $0x30] sm:$0xf] }
  0x2e   : > { %725 = vmatpush.bf16.msra.mxu0 %v1337_v21  ;;  %1384 = vmatpush.bf16.msra.mxu3 %v1337_v21  ;;  %428 = vst [vmem:[#allocation2 + $0x28] sm:$0xf] %v1159_v32  ;;  %v1161_v41 = vld [vmem:[%s1594_s10 + $0x34] sm:$0xf]  ;;  %v1342_v43 = vld [vmem:[%s1824_s2 + $0x48] sm:$0xff]  ;;  %v1341_v47 = vld [vmem:[%s1824_s2 + $0x40] sm:$0xff] }
  0x2f   : > { %754 = vmatpush.bf16.msra.mxu1 %v1345_v22  ;;  %443 = vst [vmem:[#allocation2 + $0x20] sm:$0xf] %v1166_v33  ;;  %v1350_v44 = vld [vmem:[%s1824_s2 + $0x88] sm:$0xff]  ;;  %v1168_v45 = vld [vmem:[%s1594_s10 + $0x14] sm:$0xf]  ;;  %v1349_v50 = vld [vmem:[%s1824_s2 + $0x80] sm:$0xff] }
  0x30   : > { %783 = vmatpush.bf16.msra.mxu2 %v1353_v24  ;;  %444 = vst [vmem:[#allocation2 + $0x2c] sm:$0xf] %v1167_v34  ;;  %v1173_v48 = vld [vmem:[#allocation2] sm:$0xf]  ;;  %v1169_v49 = vld [vmem:[%s1594_s10 + $0x18] sm:$0xf] }
  0x31   : > { %412 = vst [vmem:[#allocation2 + $0x30] sm:$0xf] %v404_v37  ;;  %v1322_v51 = vld [vmem:[#allocation2 + $0x8] sm:$0xf0]  ;;  %v1321_v52 = vld [vmem:[#allocation2 + $0x4] sm:$0xf] }
  0x32   : > { %726 = vmatpush.bf16.msra.mxu0 %v1336_v26  ;;  %1385 = vmatpush.bf16.msra.mxu3 %v1336_v26  ;;  %413 = vst [vmem:[#allocation2 + $0x3c] sm:$0xf] %v405_v39  ;;  %v1175_v53 = vld [vmem:[#allocation2 + $0xc] sm:$0xf0]  ;;  %v1181_v54 = vld [vmem:[#allocation2 + $0x8] sm:$0xf]  ;;  %v1174_v58 = vor.u32 %v1322_v51, %v1173_v48 }
  0x33   : > { %755 = vmatpush.bf16.msra.mxu1 %v1344_v28  ;;  %429 = vst [vmem:[#allocation2 + $0x34] sm:$0xf] %v1160_v40  ;;  %v1323_v55 = vld [vmem:[#allocation2 + $0x10] sm:$0xf0]  ;;  %v1185_v56 = vld [vmem:[#allocation2 + $0x18] sm:$0xf]  ;;  %v1178_v59 = vor.u32 %v1321_v52, %v1175_v53  ;;  %v809_v28 = vlaneseq }
  0x34   : > { %784 = vmatpush.bf16.msra.mxu2 %v1352_v29  ;;  %430 = vst [vmem:[#allocation2 + $0x40] sm:$0xf] %v1161_v41  ;;  %v1325_v57 = vld [vmem:[#allocation2 + $0x20] sm:$0xf0]  ;;  %v406_v60 = vld [vmem:[%s1594_s10 + $0x18] sm:$0xf]  ;;  %v1182_v62 = vor.u32 %v1323_v55, %v1181_v54 }
  0x35   : > { %445 = vst [vmem:[#allocation2 + $0x38] sm:$0xf] %v1168_v45  ;;  %v407_v61 = vld [vmem:[%s1594_s10 + $0x1c] sm:$0xf]  ;;  %v1186_v63 = vor.u32 %v1325_v57, %v1185_v56  ;;  %v1162_v0 = vld [vmem:[%s1594_s10 + $0x38] sm:$0xf] }
  0x36   : > { %727 = vmatpush.bf16.msra.mxu0 %v1335_v35  ;;  %1386 = vmatpush.bf16.msra.mxu3 %v1335_v35  ;;  %446 = vst [vmem:[#allocation2 + $0x44] sm:$0xf] %v1169_v49  ;;  %v1163_v1 = vld [vmem:[%s1594_s10 + $0x3c] sm:$0xf]  ;;  %v448_v3 = vld [vmem:[%s387_s8] sm:$0xf] }
  0x37   : > { %756 = vmatpush.bf16.msra.mxu1 %v1343_v36  ;;  %414 = vst [vmem:[#allocation2 + $0x48] sm:$0xf] %v406_v60  ;;  %v1170_v2 = vld [vmem:[%s1594_s10 + $0x1c] sm:$0xf]  ;;  %v1187_v5 = vld [vmem:[#allocation2 + $0x24] sm:$0xf0] }
  0x38   : > { %785 = vmatpush.bf16.msra.mxu2 %v1351_v38  ;;  %415 = vst [vmem:[#allocation2 + $0x54] sm:$0xf] %v407_v61  ;;  %v1324_v4 = vld [vmem:[#allocation2 + $0x1c] sm:$0xf]  ;;  %v1193_v6 = vld [vmem:[#allocation2 + $0x20] sm:$0xf] }
  0x39   : > { %431 = vst [vmem:[#allocation2 + $0x4c] sm:$0xf] %v1162_v0  ;;  %v1326_v7 = vld [vmem:[#allocation2 + $0x28] sm:$0xf0]  ;;  %v1197_v8 = vld [vmem:[#allocation2 + $0x30] sm:$0xf]  ;;  %v1190_v10 = vor.u32 %v1324_v4, %v1187_v5 }
  0x3a   : > { %728 = vmatpush.bf16.msra.mxu0 %v1334_v42  ;;  %1387 = vmatpush.bf16.msra.mxu3 %v1334_v42  ;;  %432 = vst [vmem:[#allocation2 + $0x58] sm:$0xf] %v1163_v1  ;;  %v1328_v9 = vld [vmem:[#allocation2 + $0x38] sm:$0xf0]  ;;  %v1194_v11 = vor.u32 %v1326_v7, %v1193_v6  ;;  %v1327_v13 = vld [vmem:[#allocation2 + $0x34] sm:$0xf] }
  0x3b   : > { %757 = vmatpush.bf16.msra.mxu1 %v1342_v43  ;;  %447 = vst [vmem:[#allocation2 + $0x50] sm:$0xf] %v1170_v2  ;;  %v1198_v12 = vor.u32 %v1328_v9, %v1197_v8  ;;  %v1199_v14 = vld [vmem:[#allocation2 + $0x3c] sm:$0xf0]  ;;  %v1674_v31 = vand.u32 127, %v809_v28 }
  0x3c   : > { %786 = vmatpush.bf16.msra.mxu2 %v1350_v44  ;;  %449 = vst [vmem:[#allocation2 + $0x5c] sm:$0xf] %v448_v3  ;;  %v1205_v15 = vld [vmem:[#allocation2 + $0x38] sm:$0xf]  ;;  %v1202_v19 = vor.u32 %v1327_v13, %v1199_v14  ;;  %v1490_v14 = vmov 32.0  }
  0x3d   : > { %v1329_v16 = vld [vmem:[#allocation2 + $0x40] sm:$0xf0]  ;;  %vm811_vm0 = vcmp.lt.s32.totalorder %v1674_v31, 32  ;;  %1432 = vrcp.f32 %v1490_v14 }
  0x3e   : > { %729 = vmatpush.bf16.msra.mxu0 %v1333_v46  ;;  %1388 = vmatpush.bf16.msra.mxu3 %v1333_v46  ;;  %v1209_v17 = vld [vmem:[#allocation2 + $0x48] sm:$0xf]  ;;  %v1206_v20 = vor.u32 %v1329_v16, %v1205_v15 }
  0x3f   : > { %758 = vmatpush.bf16.msra.mxu1 %v1341_v47  ;;  %v1331_v18 = vld [vmem:[#allocation2 + $0x50] sm:$0xf0] }
  0x40   : > { %787 = vmatpush.bf16.msra.mxu2 %v1349_v50  ;;  %v1210_v21 = vor.u32 %v1331_v18, %v1209_v17  ;;  %v1330_v22 = vld [vmem:[#allocation2 + $0x4c] sm:$0xf] }
  0x41   : > { %730 = vmatmul.bf16.vlgmr.msra.gmra.mxu0 %v1174_v58  ;;  %735 = vmatmul.bf16.vlgmr.msra.gmra.mxu3 %v1186_v63  ;;  %v1211_v23 = vld [vmem:[#allocation2 + $0x54] sm:$0xf0] }
  0x42   : > { %759 = vmatmul.bf16.vlgmr.msra.gmra.mxu1 %v1178_v59  ;;  %v1217_v24 = vld [vmem:[#allocation2 + $0x50] sm:$0xf]  ;;  %v1214_v26 = vor.u32 %v1330_v22, %v1211_v23 }
  0x43   : > { %788 = vmatmul.bf16.vlgmr.msra.gmra.mxu2 %v1182_v62  ;;  %v1332_v25 = vld [vmem:[#allocation2 + $0x58] sm:$0xf0]  ;;  %v1433_v15 = vpop.eup %1432 }
  0x44   : > { %v1218_v27 = vor.u32 %v1332_v25, %v1217_v24  ;;  %v837_v16 = vmul.f32 32.0, %v1433_v15  ;;  %vm841_vm1 = vweird.f32 %v1433_v15 }
  0x46   : > { %v838_v17 = vsub.f32 1.0, %v837_v16 }
  0x48   : > { %v839_v18 = vmul.f32 %v1433_v15, %v838_v17 }
  0x51   : > { %740 = vmatmul.bf16.gmra.mxu3 %v1198_v12 }
  0x52   : > { %764 = vmatmul.bf16.gmra.mxu1 %v1190_v10 }
  0x53   : > { %793 = vmatmul.bf16.gmra.mxu2 %v1194_v11 }
  0x61   : > { %745 = vmatmul.bf16.gmra.mxu3 %v1210_v21 }
  0x62   : > { %769 = vmatmul.bf16.gmra.mxu1 %v1202_v19  ;;  %v840_v19 = vadd.f32 %v1433_v15, %v839_v18 }
  0x63   : > { %798 = vmatmul.bf16.gmra.mxu2 %v1206_v20 }
  0x64   : > { %v1696_v20 = vsel %vm841_vm1, %v1433_v15, %v840_v19 }
  0x72   : > { %774 = vmatmul.bf16.gmra.mxu1 %v1214_v26 }
  0x73   : > { %803 = vmatmul.bf16.gmra.mxu2 %v1218_v27 }
  0xbe   : > { %v731_v30 = vpop.f32.mrf.mxu0 }
  0xbf   : > { %v760_v29 = vpop.f32.mrf.mxu1 }
  0xc0   : > { %v761_v32 = vadd.f32 %v760_v29, %v731_v30 }
  0xc4   : > { %v736_v38 = vpop.f32.mrf.mxu3 }
  0xc6   : > { %v789_v33 = vpop.f32.mrf.mxu2  ;;  %v733_v37 = vpop.f32.mrf.mxu0 }
  0xc7   : > { %v1677_v34 = vadd.f32 %v789_v33, %v761_v32  ;;  %v762_v35 = vpop.f32.mrf.mxu1 }
  0xc8   : > { %v763_v39 = vadd.f32 %v762_v35, %v733_v37 }
  0xc9   : > { %v812_v36 = vsel %vm811_vm0, %v1677_v34, 0.0 }
  0xca   : > { %820 = vadd.xlane.f32.xlu0 %v812_v36 }
  0xcc   : > { %v738_v45 = vpop.f32.mrf.mxu3 }
  0xce   : > { %v791_v40 = vpop.f32.mrf.mxu2 }
  0xcf   : > { %v792_v41 = vadd.f32 %v791_v40, %v763_v39  ;;  %v765_v42 = vpop.f32.mrf.mxu1 }
  0xd0   : > { %v766_v44 = vadd.f32 %v765_v42, %v736_v38 }
  0xd1   : > { %v813_v43 = vsel %vm811_vm0, %v792_v41, 0.0 }
  0xd2   : > { %822 = vadd.xlane.f32.xlu0 %v813_v43 }
  0xd4   : > { %v741_v51 = vpop.f32.mrf.mxu3 }
  0xd6   : > { %v794_v46 = vpop.f32.mrf.mxu2 }
  0xd7   : > { %v795_v47 = vadd.f32 %v794_v46, %v766_v44  ;;  %v767_v48 = vpop.f32.mrf.mxu1 }
  0xd8   : > { %v768_v50 = vadd.f32 %v767_v48, %v738_v45 }
  0xd9   : > { %v814_v49 = vsel %vm811_vm0, %v795_v47, 0.0 }
  0xda   : > { %824 = vadd.xlane.f32.xlu1 %v814_v49 }
  0xdc   : > { %v743_v60 = vpop.f32.mrf.mxu3 }
  0xde   : > { %v796_v52 = vpop.f32.mrf.mxu2 }
  0xdf   : > { %v797_v53 = vadd.f32 %v796_v52, %v768_v50  ;;  %v770_v54 = vpop.f32.mrf.mxu1 }
  0xe0   : > { %v771_v56 = vadd.f32 %v770_v54, %v741_v51 }
  0xe1   : > { %v815_v55 = vsel %vm811_vm0, %v797_v53, 0.0 }
  0xe2   : > { %826 = vadd.xlane.f32.xlu1 %v815_v55 }
  0xe4   : > { %v746_v3 = vpop.f32.mrf.mxu3 }
  0xe6   : > { %v799_v57 = vpop.f32.mrf.mxu2 }
  0xe7   : > { %v800_v58 = vadd.f32 %v799_v57, %v771_v56  ;;  %v772_v59 = vpop.f32.mrf.mxu1 }
  0xe8   : > { %v773_v62 = vadd.f32 %v772_v59, %v743_v60 }
  0xe9   : > { %v816_v61 = vsel %vm811_vm0, %v800_v58, 0.0 }
  0xea   : > { %828 = vadd.xlane.f32.xlu2 %v816_v61 }
  0xec   : > { %v748_v9 = vpop.f32.mrf.mxu3 }
  0xee   : > { %v801_v63 = vpop.f32.mrf.mxu2 }
  0xef   : > { %v802_v0 = vadd.f32 %v801_v63, %v773_v62  ;;  %v775_v1 = vpop.f32.mrf.mxu1 }
  0xf0   : > { %v776_v4 = vadd.f32 %v775_v1, %v746_v3 }
  0xf1   : > { %v817_v2 = vsel %vm811_vm0, %v802_v0, 0.0 }
  0xf2   : > { %830 = vadd.xlane.f32.xlu2 %v817_v2 }
  0xf6   : > { %v804_v5 = vpop.f32.mrf.mxu2 }
  0xf7   : > { %v805_v6 = vadd.f32 %v804_v5, %v776_v4  ;;  %v777_v8 = vpop.f32.mrf.mxu1 }
  0xf8   : > { %v778_v10 = vadd.f32 %v777_v8, %v748_v9 }
  0xf9   : > { %v818_v7 = vsel %vm811_vm0, %v805_v6, 0.0 }
  0xfa   : > { %832 = vadd.xlane.f32.xlu0 %v818_v7 }
  0xfe   : > { %v806_v11 = vpop.f32.mrf.mxu2 }
  0xff   : > { %v807_v12 = vadd.f32 %v806_v11, %v778_v10 }
 0x101   : > { %v819_v13 = vsel %vm811_vm0, %v807_v12, 0.0 }
 0x102   : > { %834 = vadd.xlane.f32.xlu1 %v819_v13 }
 0x13d   : > { %v821_v21 = vpop.xlane.xlu0 %820 }
 0x13e   : > { %v843_v22 = vmul.f32 %v1696_v20, %v821_v21 }
 0x140   : > { %v1700_v23 = vsub.f32 %v1677_v34, %v843_v22  ;;  %v1762_v22 = vld [vmem:[%s1825_s3] ss:$0 sm:$0xff] }
 0x142   : > { %v859_v24 = vmul.f32 %v1700_v23, %v1700_v23 }
 0x144   : > { %v867_v25 = vsel %vm811_vm0, %v859_v24, 0.0 }
 0x145   : > { %875 = vadd.xlane.f32.xlu2 %v867_v25  ;;  %v823_v26 = vpop.xlane.xlu0 %822 }
 0x146   : > { %v844_v27 = vmul.f32 %v1696_v20, %v823_v26 }
 0x148   : > { %v1707_v28 = vsub.f32 %v792_v41, %v844_v27 }
 0x14a   : > { %v860_v29 = vmul.f32 %v1707_v28, %v1707_v28 }
 0x14c   : > { %v868_v30 = vsel %vm811_vm0, %v860_v29, 0.0 }
 0x14d   : > { %v825_v32 = vpop.xlane.xlu1 %824  ;;  %877 = vadd.xlane.f32.xlu0 %v868_v30 }
 0x14e   : > { %v845_v33 = vmul.f32 %v1696_v20, %v825_v32  ;;  %v1768_v32 = vld [vmem:[%s1826_s4] ss:$0 sm:$0xff] }
 0x150   : > { %v1714_v34 = vsub.f32 %v795_v47, %v845_v33 }
 0x152   : > { %v861_v35 = vmul.f32 %v1714_v34, %v1714_v34 }
 0x154   : > { %v869_v36 = vsel %vm811_vm0, %v861_v35, 0.0 }
 0x155   : > { %v827_v37 = vpop.xlane.xlu1 %826  ;;  %879 = vadd.xlane.f32.xlu1 %v869_v36 }
 0x156   : > { %v846_v38 = vmul.f32 %v1696_v20, %v827_v37 }
 0x158   : > { %v1721_v39 = vsub.f32 %v797_v53, %v846_v38 }
 0x15a   : > { %v862_v40 = vmul.f32 %v1721_v39, %v1721_v39 }
 0x15c   : > { %v870_v41 = vsel %vm811_vm0, %v862_v40, 0.0 }
 0x15d   : > { %v829_v42 = vpop.xlane.xlu2 %828  ;;  %881 = vadd.xlane.f32.xlu2 %v870_v41 }
 0x15e   : > { %v847_v43 = vmul.f32 %v1696_v20, %v829_v42 }
 0x160   : > { %v1728_v44 = vsub.f32 %v800_v58, %v847_v43 }
 0x162   : > { %v863_v45 = vmul.f32 %v1728_v44, %v1728_v44 }
 0x164   : > { %v871_v46 = vsel %vm811_vm0, %v863_v45, 0.0 }
 0x165   : > { %v831_v47 = vpop.xlane.xlu2 %830  ;;  %883 = vadd.xlane.f32.xlu0 %v871_v46 }
 0x166   : > { %v848_v48 = vmul.f32 %v1696_v20, %v831_v47 }
 0x168   : > { %v1735_v49 = vsub.f32 %v802_v0, %v848_v48 }
 0x16a   : > { %v864_v50 = vmul.f32 %v1735_v49, %v1735_v49 }
 0x16c   : > { %v872_v51 = vsel %vm811_vm0, %v864_v50, 0.0 }
 0x16d   : > { %885 = vadd.xlane.f32.xlu1 %v872_v51  ;;  %v833_v52 = vpop.xlane.xlu0 %832 }
 0x16e   : > { %v849_v53 = vmul.f32 %v1696_v20, %v833_v52 }
 0x170   : > { %v1742_v54 = vsub.f32 %v805_v6, %v849_v53 }
 0x172   : > { %v865_v55 = vmul.f32 %v1742_v54, %v1742_v54 }
 0x174   : > { %v873_v56 = vsel %vm811_vm0, %v865_v55, 0.0 }
 0x175   : > { %v835_v57 = vpop.xlane.xlu1 %834  ;;  %887 = vadd.xlane.f32.xlu2 %v873_v56 }
 0x176   : > { %v850_v58 = vmul.f32 %v1696_v20, %v835_v57 }
 0x178   : > { %v1749_v59 = vsub.f32 %v807_v12, %v850_v58 }
 0x17a   : > { %v866_v60 = vmul.f32 %v1749_v59, %v1749_v59 }
 0x17c   : > { %v874_v61 = vsel %vm811_vm0, %v866_v60, 0.0 }
 0x17d   : > { %889 = vadd.xlane.f32.xlu0 %v874_v61 }
 0x1b8   : > { %v876_v62 = vpop.xlane.xlu2 %875 }
 0x1b9   : > { %v891_v63 = vmul.f32 %v876_v62, %v1696_v20 }
 0x1bb   : > { %v899_v0 = vadd.f32 1e-05, %v891_v63 }
 0x1bd   : > { %1434 = vrsqrt.f32 %v899_v0  ;;  %vm913_vm3 = vweird.f32 %v899_v0 }
 0x1c0   : > { %v878_v1 = vpop.xlane.xlu0 %877 }
 0x1c1   : > { %v892_v2 = vmul.f32 %v878_v1, %v1696_v20 }
 0x1c3   : > { %v1435_v3 = vpop.eup %1434  ;;  %v900_v4 = vadd.f32 1e-05, %v892_v2 }
 0x1c4   : > { %v908_v5 = vmul.f32 %v1435_v3, %v899_v0  ;;  %vm914_vm2 = vweird.f32 %v1435_v3 }
 0x1c5   : > { %1436 = vrsqrt.f32 %v900_v4  ;;  %vm915_vm4 = vmor %vm913_vm3, %vm914_vm2  ;;  %vm923_vm6 = vweird.f32 %v900_v4 }
 0x1c6   : > { %v909_v6 = vmul.f32 %v1435_v3, %v908_v5 }
 0x1c8   : > { %v910_v7 = vmul.f32 0.5, %v909_v6  ;;  %v880_v8 = vpop.xlane.xlu1 %879 }
 0x1c9   : > { %v893_v9 = vmul.f32 %v880_v8, %v1696_v20 }
 0x1ca   : > { %v911_v31 = vsub.f32 1.5, %v910_v7 }
 0x1cb   : > { %v1437_v10 = vpop.eup %1436  ;;  %v901_v11 = vadd.f32 1e-05, %v893_v9 }
 0x1cc   : > { %v912_v12 = vmul.f32 %v1435_v3, %v911_v31  ;;  %v918_v13 = vmul.f32 %v1437_v10, %v900_v4  ;;  %vm924_vm5 = vweird.f32 %v1437_v10 }
 0x1cd   : > { %1438 = vrsqrt.f32 %v901_v11  ;;  %vm925_vm7 = vmor %vm923_vm6, %vm924_vm5  ;;  %vm933_vm9 = vweird.f32 %v901_v11 }
 0x1ce   : > { %v919_v14 = vmul.f32 %v1437_v10, %v918_v13  ;;  %v916_v15 = vsel %vm915_vm4, %v1435_v3, %v912_v12 }
 0x1cf   : > { %v987_v24 = vmul.f32 %v916_v15, %v1700_v23 }
 0x1d0   : > { %v920_v16 = vmul.f32 0.5, %v919_v14  ;;  %v882_v17 = vpop.xlane.xlu2 %881 }
 0x1d1   : > { %v894_v18 = vmul.f32 %v882_v17, %v1696_v20  ;;  %v999_v33 = vmul.f32 %v1762_v22, %v987_v24 }
 0x1d2   : > { %v921_v19 = vsub.f32 1.5, %v920_v16 }
 0x1d3   : > { %v1439_v21 = vpop.eup %1438  ;;  %v902_v25 = vadd.f32 1e-05, %v894_v18  ;;  %v1011_v42 = vadd.f32 %v1768_v32, %v999_v33 }
 0x1d4   : > { %v922_v26 = vmul.f32 %v1437_v10, %v921_v19  ;;  %v928_v27 = vmul.f32 %v1439_v21, %v901_v11  ;;  %vm934_vm8 = vweird.f32 %v1439_v21 }
 0x1d5   : > { %1440 = vrsqrt.f32 %v902_v25  ;;  %vm935_vm10 = vmor %vm933_vm9, %vm934_vm8  ;;  %vm943_vm12 = vweird.f32 %v902_v25 }
 0x1d6   : > { %v926_v29 = vsel %vm925_vm7, %v1437_v10, %v922_v26  ;;  %v929_v30 = vmul.f32 %v1439_v21, %v928_v27 }
 0x1d7   : > { %v988_v35 = vmul.f32 %v926_v29, %v1707_v28 }
 0x1d8   : > { %v930_v36 = vmul.f32 0.5, %v929_v30  ;;  %v884_v37 = vpop.xlane.xlu0 %883 }
 0x1d9   : > { %v1000_v23 = vmul.f32 %v1762_v22, %v988_v35  ;;  %v895_v38 = vmul.f32 %v884_v37, %v1696_v20 }
 0x1da   : > { %v931_v40 = vsub.f32 1.5, %v930_v36 }
 0x1db   : > { %v1441_v41 = vpop.eup %1440  ;;  %v1012_v43 = vadd.f32 %v1768_v32, %v1000_v23  ;;  %v903_v45 = vadd.f32 1e-05, %v895_v38 }
 0x1dc   : > { %v932_v28 = vmul.f32 %v1439_v21, %v931_v40  ;;  %v938_v46 = vmul.f32 %v1441_v41, %v902_v25  ;;  %vm944_vm11 = vweird.f32 %v1441_v41 }
 0x1dd   : > { %v1360_v47 = vpack.c.bf16 %v1012_v43, %v1011_v42  ;;  %1442 = vrsqrt.f32 %v903_v45  ;;  %vm945_vm13 = vmor %vm943_vm12, %vm944_vm11  ;;  %vm953_vm15 = vweird.f32 %v903_v45 }
 0x1de   : > { %v939_v48 = vmul.f32 %v1441_v41, %v938_v46  ;;  %v936_v50 = vsel %vm935_vm10, %v1439_v21, %v932_v28 }
 0x1df   : > { %1361 = vst [vmem:[%s1780_s16] sm:$0xff] %v1360_v47   ;;  %v989_v57 = vmul.f32 %v936_v50, %v1714_v34 }
 0x1e0   : > { %v940_v51 = vmul.f32 0.5, %v939_v48  ;;  %v886_v52 = vpop.xlane.xlu1 %885 }
 0x1e1   : > { %v896_v53 = vmul.f32 %v886_v52, %v1696_v20  ;;  %v1001_v0 = vmul.f32 %v1762_v22, %v989_v57 }
 0x1e2   : > { %v941_v55 = vsub.f32 1.5, %v940_v51 }
 0x1e3   : > { %v1443_v56 = vpop.eup %1442  ;;  %v904_v58 = vadd.f32 1e-05, %v896_v53  ;;  %v1013_v7 = vadd.f32 %v1768_v32, %v1001_v0 }
 0x1e4   : > { %v942_v60 = vmul.f32 %v1441_v41, %v941_v55  ;;  %v948_v61 = vmul.f32 %v1443_v56, %v903_v45  ;;  %vm954_vm14 = vweird.f32 %v1443_v56 }
 0x1e5   : > { %1444 = vrsqrt.f32 %v904_v58  ;;  %vm955_vm0 = vmor %vm953_vm15, %vm954_vm14  ;;  %vm963_vm2 = vweird.f32 %v904_v58 }
 0x1e6   : > { %v946_v62 = vsel %vm945_vm13, %v1441_v41, %v942_v60  ;;  %v949_v63 = vmul.f32 %v1443_v56, %v948_v61 }
 0x1e7   : > { %v990_v1 = vmul.f32 %v946_v62, %v1721_v39 }
 0x1e8   : > { %v950_v2 = vmul.f32 0.5, %v949_v63  ;;  %v888_v3 = vpop.xlane.xlu2 %887 }
 0x1e9   : > { %v1002_v4 = vmul.f32 %v1762_v22, %v990_v1  ;;  %v897_v5 = vmul.f32 %v888_v3, %v1696_v20 }
 0x1ea   : > { %v951_v34 = vsub.f32 1.5, %v950_v2 }
 0x1eb   : > { %v1445_v6 = vpop.eup %1444  ;;  %v1014_v8 = vadd.f32 %v1768_v32, %v1002_v4  ;;  %v905_v9 = vadd.f32 1e-05, %v897_v5 }
 0x1ec   : > { %v952_v31 = vmul.f32 %v1443_v56, %v951_v34  ;;  %v958_v10 = vmul.f32 %v1445_v6, %v904_v58  ;;  %vm964_vm1 = vweird.f32 %v1445_v6 }
 0x1ed   : > { %v1365_v11 = vpack.c.bf16 %v1014_v8, %v1013_v7  ;;  %1446 = vrsqrt.f32 %v905_v9  ;;  %vm965_vm3 = vmor %vm963_vm2, %vm964_vm1  ;;  %vm973_vm5 = vweird.f32 %v905_v9 }
 0x1ee   : > { %v959_v39 = vmul.f32 %v1445_v6, %v958_v10  ;;  %v956_v12 = vsel %vm955_vm0, %v1443_v56, %v952_v31 }
 0x1ef   : > { %1378 = vst [vmem:[%s1780_s16 + $0x8] sm:$0xff] %v1365_v11   ;;  %v991_v18 = vmul.f32 %v956_v12, %v1728_v44 }
 0x1f0   : > { %v960_v13 = vmul.f32 0.5, %v959_v39  ;;  %v890_v14 = vpop.xlane.xlu0 %889 }
 0x1f1   : > { %v898_v15 = vmul.f32 %v890_v14, %v1696_v20  ;;  %v1003_v27 = vmul.f32 %v1762_v22, %v991_v18 }
 0x1f2   : > { %v961_v16 = vsub.f32 1.5, %v960_v13 }
 0x1f3   : > { %v1447_v17 = vpop.eup %1446  ;;  %v906_v19 = vadd.f32 1e-05, %v898_v15  ;;  %v1015_v44 = vadd.f32 %v1768_v32, %v1003_v27 }
 0x1f4   : > { %v962_v21 = vmul.f32 %v1445_v6, %v961_v16  ;;  %v968_v24 = vmul.f32 %v1447_v17, %v905_v9  ;;  %vm974_vm4 = vweird.f32 %v1447_v17 }
 0x1f5   : > { %1448 = vrsqrt.f32 %v906_v19  ;;  %vm975_vm6 = vmor %vm973_vm5, %vm974_vm4  ;;  %vm983_vm8 = vweird.f32 %v906_v19 }
 0x1f6   : > { %v966_v25 = vsel %vm965_vm3, %v1445_v6, %v962_v21  ;;  %v969_v26 = vmul.f32 %v1447_v17, %v968_v24 }
 0x1f7   : > { %v992_v29 = vmul.f32 %v966_v25, %v1735_v49 }
 0x1f8   : > { %v970_v30 = vmul.f32 0.5, %v969_v26 }
 0x1f9   : > { %v1004_v20 = vmul.f32 %v1762_v22, %v992_v29 }
 0x1fa   : > { %v971_v33 = vsub.f32 1.5, %v970_v30 }
 0x1fb   : > { %v1449_v35 = vpop.eup %1448  ;;  %v1016_v36 = vadd.f32 %v1768_v32, %v1004_v20 }
 0x1fc   : > { %v972_v37 = vmul.f32 %v1447_v17, %v971_v33  ;;  %v978_v23 = vmul.f32 %v1449_v35, %v906_v19  ;;  %vm984_vm7 = vweird.f32 %v1449_v35 }
 0x1fd   : > { %v1370_v38 = vpack.c.bf16 %v1016_v36, %v1015_v44  ;;  %vm985_vm9 = vmor %vm983_vm8, %vm984_vm7 }
 0x1fe   : > { %v979_v40 = vmul.f32 %v1449_v35, %v978_v23  ;;  %v976_v41 = vsel %vm975_vm6, %v1447_v17, %v972_v37 }
 0x1ff   : > { %1379 = vst [vmem:[%s1780_s16 + $0x10] sm:$0xff] %v1370_v38   ;;  %v993_v43 = vmul.f32 %v976_v41, %v1742_v54 }
 0x200   : > { %v980_v49 = vmul.f32 0.5, %v979_v40 }
 0x201   : > { %v1005_v46 = vmul.f32 %v1762_v22, %v993_v43 }
 0x202   : > { %v981_v42 = vsub.f32 1.5, %v980_v49 }
 0x203   : > { %v1017_v50 = vadd.f32 %v1768_v32, %v1005_v46 }
 0x204   : > { %v982_v45 = vmul.f32 %v1449_v35, %v981_v42 }
 0x206   : > { %v986_v28 = vsel %vm985_vm9, %v1449_v35, %v982_v45 }
 0x207   : > { %v994_v47 = vmul.f32 %v986_v28, %v1749_v59 }
 0x209   : > { %v1006_v48 = vmul.f32 %v1762_v22, %v994_v47 }
 0x20b   : > { %v1018_v51 = vadd.f32 %v1768_v32, %v1006_v48 }
 0x20d   : > { %v1375_v52 = vpack.c.bf16 %v1018_v51, %v1017_v50 }
 0x20f   : > { %1380 = vst [vmem:[%s1780_s16 + $0x18] sm:$0xff] %v1375_v52  }
 0x210 PF: > { %s15_s22 = sadd.s32 1, %s1488_s22   ;;  %s1828_s18 = smov %s1476_s19 }
 0x211   : > { %p12_p10 = scmp.ge.s32.totalorder %s15_s22, 4   ;;  %s1829_s19 = smov %s1556_s26 }
 0x212   : > { %s1830_s20 = smov %s1484_s21  ;;  %s1831_s21 = smov %s1833_s23 }
 0x213   :  { %14 = sbr.rel (!%p12_p10) target bundleno = 3 (0x3), region = 121 }

</bundles_post_ra>
